<compile_context>
chip_gen: v7x
topology: tpu7x:2x2x1
jax: 0.10.0
libtpu: 0.0.40
codegen_flags: <defaults>
</compile_context>

<pallas_src>
import functools

import jax
import jax.numpy as jnp
from jax import lax
from jax.experimental import pallas as pl
from jax.experimental.pallas import tpu as pltpu


def _sublayer_kernel(seed_ref, x_ref, a2_ref, b2_ref, w_ref, bias_ref, o_ref,
                     *, eps, dropout_rate, training):
    # x tile: (tm, D) -- full feature axis, needed for the LayerNorm reduction.
    x = x_ref[...].astype(jnp.float32)
    d = x.shape[-1]
    tn = o_ref.shape[-1]

    # --- LayerNorm (torch tensor.std() semantics: unbiased variance, eps added to std) ---
    mean = jnp.sum(x, axis=-1, keepdims=True) * jnp.float32(1.0 / d)
    xc = x - mean
    var_unbiased = jnp.sum(xc * xc, axis=-1, keepdims=True) * jnp.float32(1.0 / (d - 1))
    inv_std = pl.reciprocal(jnp.sqrt(var_unbiased) + jnp.float32(eps), approx=True)  # EUP
    normed = (a2_ref[...] * xc) * inv_std + b2_ref[...]

    # --- sublayer: Linear(D -> D), this grid step computes output columns [j*tn, (j+1)*tn) ---
    # bf16 MXU inputs, f32 accumulate.
    y = jnp.dot(normed.astype(w_ref.dtype), w_ref[...],
                preferred_element_type=jnp.float32) + bias_ref[...].astype(jnp.float32)

    # --- dropout (training only; eval mode traces nothing here) ---
    if training and dropout_rate > 0.0:
        # TODO(synk): Pallas PRNG is deterministic per-seed but not bit-identical to torch RNG.
        tile_id = pl.program_id(0) * pl.num_programs(1) + pl.program_id(1)
        pltpu.prng_seed(seed_ref[0] + tile_id)
        bits = pltpu.prng_random_bits(y.shape)
        if bits.dtype != jnp.uint32:
            bits = pltpu.bitcast(bits, jnp.uint32)
        thresh = jnp.uint32(min(int(dropout_rate * (1 << 32)), (1 << 32) - 1))
        keep = bits >= thresh                       # P(keep) = 1 - dropout_rate
        scale = jnp.float32(1.0 / (1.0 - dropout_rate))
        y = jnp.where(keep, y * scale, jnp.float32(0.0))

    # --- residual add: only the j-th column slice of x ---
    if tn == d:
        x_res = x
    else:
        start = pl.multiple_of(pl.program_id(1) * tn, 128)
        x_res = x_ref[:, pl.ds(start, tn)].astype(jnp.float32)
    o_ref[...] = (x_res + y).astype(o_ref.dtype)


def sublayer_connection(x, a2, b2, w, bias, *, eps=1e-5, dropout_rate=0.0,
                        training=False, seed=0, tm=256, tn=None,
                        compute_dtype=jnp.bfloat16):
    """x: (B, S, D) float32.  Returns x + dropout(Linear(LayerNorm(x))).

    tm: row tile (sweep 128..1024 on real shapes).  tn: output-column tile for W
    (defaults to min(D, 2048); shrink on v7x for very large D).
    """
    B, S, D = x.shape
    R = B * S
    # TODO(synk): if D % 128 != 0, pad D to a multiple of 128 and mask the LayerNorm
    # reduction instead of using a non-lane-aligned last block dim.
    assert D % 128 == 0, "D must be a multiple of 128 (pad + mask otherwise)"

    tm = min(tm, R)
    assert R % tm == 0 and (tm % 8 == 0 or tm == R), \
        "row tile must divide B*S and be a multiple of 8 (or the full row count)"

    if tn is None:
        tn = min(D, 2048)
    assert D % tn == 0 and tn % 128 == 0, "tn must divide D and be a multiple of 128"
    num_n = D // tn

    x2 = x.reshape(R, D)
    a2_ = a2.reshape(1, D).astype(jnp.float32)
    b2_ = b2.reshape(1, D).astype(jnp.float32)
    w_c = w.astype(compute_dtype)                 # bf16 weights: half the DMA/VMEM
    bias_ = bias.reshape(1, D).astype(jnp.float32)
    seed_arr = jnp.asarray([seed], dtype=jnp.int32)

    kernel = functools.partial(_sublayer_kernel, eps=eps,
                               dropout_rate=dropout_rate, training=training)

    grid_spec = pltpu.PrefetchScalarGridSpec(
        num_scalar_prefetch=1,                    # seed -> SMEM, passed to index_maps too
        grid=(R // tm, num_n),
        in_specs=[
            pl.BlockSpec((tm, D), lambda i, j, seed: (i, 0)),   # x rows (full D for LN)
            pl.BlockSpec((1, D), lambda i, j, seed: (0, 0)),    # a_2 (resident)
            pl.BlockSpec((1, D), lambda i, j, seed: (0, 0)),    # b_2 (resident)
            pl.BlockSpec((D, tn), lambda i, j, seed: (0, j)),   # W column block
            pl.BlockSpec((1, tn), lambda i, j, seed: (0, j)),   # bias column block
        ],
        out_specs=pl.BlockSpec((tm, tn), lambda i, j, seed: (i, j)),
    )

    out = pl.pallas_call(
        kernel,
        out_shape=jax.ShapeDtypeStruct((R, D), x.dtype),
        grid_spec=grid_spec,
        compiler_params=pltpu.CompilerParams(
            dimension_semantics=("parallel", "parallel"),   # independent tiles -> megacore
            vmem_limit_bytes=48 * 1024 * 1024),
    )(seed_arr, x2, a2_, b2_, w_c, bias_)

    return out.reshape(B, S, D)


def _reference(x, a2, b2, w, bias, eps=1e-5):
    # Pure-JAX reference (eval mode, dropout = identity), torch-matching LayerNorm, f32 matmul.
    mean = jnp.mean(x, axis=-1, keepdims=True)
    xc = x - mean
    d = x.shape[-1]
    std = jnp.sqrt(jnp.sum(xc * xc, axis=-1, keepdims=True) / (d - 1))
    normed = a2 * xc / (std + eps) + b2
    y = normed @ w + bias
    return x + y


if __name__ == "__main__":
    B, S, D = 2, 8, 128
    key = jax.random.PRNGKey(0)
    kx, kw, kb = jax.random.split(key, 3)

    x = jax.random.normal(kx, (B, S, D), dtype=jnp.float32)

    # LayerNorm params per module __init__: ones / zeros
    a2 = jnp.ones((D,), dtype=jnp.float32)
    b2 = jnp.zeros((D,), dtype=jnp.float32)

    # Deterministic sublayer = Linear(D, D)
    w = jax.random.normal(kw, (D, D), dtype=jnp.float32) * (1.0 / jnp.sqrt(D))
    bias = jax.random.normal(kb, (D,), dtype=jnp.float32) * 0.01

    # Eval mode (dropout is identity), matching module.eval() semantics.
    out = sublayer_connection(x, a2, b2, w, bias, eps=1e-5,
                              dropout_rate=0.1, training=False)
    out = jax.block_until_ready(out)

    ref = _reference(x, a2, b2, w, bias)
    # Tolerance accounts for the bf16 MXU inputs + approx (EUP) reciprocal in the kernel.
    assert jnp.allclose(out, ref, atol=5e-2, rtol=5e-2), "mismatch vs reference"

    print("KERNEL_OK")
</pallas_src>

<mosaic_0001>
module attributes {stable_mosaic.version = 11 : i64} {
  func.func @_sublayer_kernel(%arg0: i32, %arg1: i32, %arg2: memref<1xi32, #tpu.memory_space<smem>>, %arg3: memref<16x128xf32, #tpu.memory_space<vmem>>, %arg4: memref<1x128xf32, #tpu.memory_space<vmem>>, %arg5: memref<1x128xf32, #tpu.memory_space<vmem>>, %arg6: memref<128x128xbf16, #tpu.memory_space<vmem>>, %arg7: memref<1x128xf32, #tpu.memory_space<vmem>>, %arg8: memref<16x128xf32, #tpu.memory_space<vmem>>) attributes {dimension_semantics = [#tpu.dimension_semantics<parallel>, #tpu.dimension_semantics<parallel>], iteration_bounds = array<i64: 1, 1>, scalar_prefetch = 1 : i64, scratch_operands = 0 : i64, tpu.core_type = #tpu.core_type<tc>, window_params = [{transform_indices = @transform_0, window_bounds = array<i64: 16, 128>}, {pipeline_mode = #tpu.pipeline_mode<synchronous>, transform_indices = @transform_1, window_bounds = array<i64: 1, 128>}, {pipeline_mode = #tpu.pipeline_mode<synchronous>, transform_indices = @transform_2, window_bounds = array<i64: 1, 128>}, {transform_indices = @transform_3, window_bounds = array<i64: 128, 128>}, {transform_indices = @transform_4, window_bounds = array<i64: 1, 128>}, {transform_indices = @transform_5, window_bounds = array<i64: 16, 128>}]} {
    %c0 = arith.constant 0 : index
    %c0_0 = arith.constant 0 : index
    %0 = vector.load %arg3[%c0, %c0_0] : memref<16x128xf32, #tpu.memory_space<vmem>>, vector<16x128xf32>
    %cst = arith.constant dense<0.000000e+00> : vector<16xf32>
    %1 = vector.multi_reduction <add>, %0, %cst [1] : vector<16x128xf32> to vector<16xf32>
    %2 = vector.shape_cast %1 : vector<16xf32> to vector<16x1xf32>
    %cst_1 = arith.constant 7.812500e-03 : f32
    %3 = vector.broadcast %cst_1 : f32 to vector<16x1xf32>
    %4 = arith.mulf %2, %3 : vector<16x1xf32>
    %5 = vector.broadcast %4 : vector<16x1xf32> to vector<16x128xf32>
    %6 = arith.subf %0, %5 : vector<16x128xf32>
    %7 = arith.mulf %6, %6 : vector<16x128xf32>
    %cst_2 = arith.constant dense<0.000000e+00> : vector<16xf32>
    %8 = vector.multi_reduction <add>, %7, %cst_2 [1] : vector<16x128xf32> to vector<16xf32>
    %9 = vector.shape_cast %8 : vector<16xf32> to vector<16x1xf32>
    %cst_3 = arith.constant 0.00787401571 : f32
    %10 = vector.broadcast %cst_3 : f32 to vector<16x1xf32>
    %11 = arith.mulf %9, %10 : vector<16x1xf32>
    %12 = math.sqrt %11 : vector<16x1xf32>
    %cst_4 = arith.constant 9.99999974E-6 : f32
    %13 = vector.broadcast %cst_4 : f32 to vector<16x1xf32>
    %14 = arith.addf %12, %13 : vector<16x1xf32>
    %15 = tpu.reciprocal %14 {approx = true} : vector<16x1xf32> -> vector<16x1xf32>
    %c0_5 = arith.constant 0 : index
    %c0_6 = arith.constant 0 : index
    %16 = vector.load %arg4[%c0_5, %c0_6] : memref<1x128xf32, #tpu.memory_space<vmem>>, vector<1x128xf32>
    %17 = vector.broadcast %16 : vector<1x128xf32> to vector<16x128xf32>
    %18 = arith.mulf %17, %6 : vector<16x128xf32>
    %19 = vector.broadcast %15 : vector<16x1xf32> to vector<16x128xf32>
    %20 = arith.mulf %18, %19 : vector<16x128xf32>
    %c0_7 = arith.constant 0 : index
    %c0_8 = arith.constant 0 : index
    %21 = vector.load %arg5[%c0_7, %c0_8] : memref<1x128xf32, #tpu.memory_space<vmem>>, vector<1x128xf32>
    %22 = vector.broadcast %21 : vector<1x128xf32> to vector<16x128xf32>
    %23 = arith.addf %20, %22 : vector<16x128xf32>
    %24 = arith.truncf %23 : vector<16x128xf32> to vector<16x128xbf16>
    %c0_9 = arith.constant 0 : index
    %c0_10 = arith.constant 0 : index
    %25 = vector.load %arg6[%c0_9, %c0_10] : memref<128x128xbf16, #tpu.memory_space<vmem>>, vector<128x128xbf16>
    %cst_11 = arith.constant dense<0.000000e+00> : vector<16x128xf32>
    %26 = tpu.matmul %24, %25, %cst_11 {dimension_numbers = #tpu.dot_dimension_numbers<[1], [0], [0], [1], [0, 0, 1, 1], [], []>} : vector<16x128xbf16>, vector<128x128xbf16>, vector<16x128xf32> -> vector<16x128xf32>
    %c0_12 = arith.constant 0 : index
    %c0_13 = arith.constant 0 : index
    %27 = vector.load %arg7[%c0_12, %c0_13] : memref<1x128xf32, #tpu.memory_space<vmem>>, vector<1x128xf32>
    %28 = vector.broadcast %27 : vector<1x128xf32> to vector<16x128xf32>
    %29 = arith.addf %26, %28 : vector<16x128xf32>
    %30 = arith.addf %0, %29 : vector<16x128xf32>
    %c0_14 = arith.constant 0 : index
    %c0_15 = arith.constant 0 : index
    %31 = vector.load %arg8[%c0_14, %c0_15] : memref<16x128xf32, #tpu.memory_space<vmem>>, vector<16x128xf32>
    tpu.vector_store %arg8[%c0_14, %c0_15], %30 {strides = array<i32>} : memref<16x128xf32, #tpu.memory_space<vmem>>, vector<16x128xf32>,
    return
  }
  func.func @transform_0(%arg0: i32, %arg1: i32, %arg2: memref<1xi32, #tpu.memory_space<smem>>) -> (i32, i32) {
    %c0_i32 = arith.constant 0 : i32
    %c0_i32_0 = arith.constant 0 : i32
    return %arg0, %c0_i32 : i32, i32
  }
  func.func @transform_1(%arg0: i32, %arg1: i32, %arg2: memref<1xi32, #tpu.memory_space<smem>>) -> (i32, i32) {
    %c0_i32 = arith.constant 0 : i32
    %c0_i32_0 = arith.constant 0 : i32
    %c0_i32_1 = arith.constant 0 : i32
    return %c0_i32, %c0_i32_0 : i32, i32
  }
  func.func @transform_2(%arg0: i32, %arg1: i32, %arg2: memref<1xi32, #tpu.memory_space<smem>>) -> (i32, i32) {
    %c0_i32 = arith.constant 0 : i32
    %c0_i32_0 = arith.constant 0 : i32
    %c0_i32_1 = arith.constant 0 : i32
    return %c0_i32, %c0_i32_0 : i32, i32
  }
  func.func @transform_3(%arg0: i32, %arg1: i32, %arg2: memref<1xi32, #tpu.memory_space<smem>>) -> (i32, i32) {
    %c0_i32 = arith.constant 0 : i32
    %c0_i32_0 = arith.constant 0 : i32
    return %c0_i32, %arg1 : i32, i32
  }
  func.func @transform_4(%arg0: i32, %arg1: i32, %arg2: memref<1xi32, #tpu.memory_space<smem>>) -> (i32, i32) {
    %c0_i32 = arith.constant 0 : i32
    %c0_i32_0 = arith.constant 0 : i32
    return %c0_i32, %arg1 : i32, i32
  }
  func.func @transform_5(%arg0: i32, %arg1: i32, %arg2: memref<1xi32, #tpu.memory_space<smem>>) -> (i32, i32) {
    %c0_i32 = arith.constant 0 : i32
    return %arg0, %arg1 : i32, i32
  }
}

</mosaic_0001>

<bundles_post_ra>
// kernel: tpu_custom_call.1
= control target key start
LH: loop header
LB: loop body
LE: loop exit
PB: predicated region body
PF: predicated region fallthrough
CT: control target
= control target key end

     0   :  { %12 = vsyncpa [#allocation5], 0  ;;  %s485_s0 = inlined_call_operand.<no memory space> [shape: s32[1], index: 0, kind: input, shape index: {}]   ;;  %s486_s1 = inlined_call_operand.hbm [shape: f32[16,128], index: 1, kind: input, shape index: {}]   ;;  %s487_s2 = inlined_call_operand.vmem [shape: f32[1,128], index: 2, kind: input, shape index: {}]   ;;  %s488_s3 = inlined_call_operand.vmem [shape: f32[1,128], index: 3, kind: input, shape index: {}]   ;;  %s489_s4 = inlined_call_operand.hbm [shape: bf16[128,128], index: 4, kind: input, shape index: {}]   ;;  %s490_s5 = inlined_call_operand.vmem [shape: f32[1,128], index: 5, kind: input, shape index: {}]   ;;  %s491_s6 = inlined_call_operand.hbm [shape: f32[16,128], index: 6, kind: output, shape index: {}]  }
   0x1   :  { %13 = vsyncpa [#allocation8], 0 }
   0x2   :  { %14 = vsyncpa [#allocation6], 0  ;;  %s380_s0 = smov [#allocation4]   ;;  %s308_s24 = scalar_lea.hbm %s486_s1, 256 }
   0x3   :  { %s20_s21 = sshll.u32 %s380_s0, 4  ;;  %p309_p0 = scmp.ne.s32.totalorder %s486_s1, %s308_s24  ;;  %s21_s21 = int_to_ptr.vmem [resolvable:$true] %s20_s21 }
   0x4   :  { %p312_p1 = scmp.lt.u32.totalorder %s308_s24, %s486_s1 }
   0x6   :  { %p314_p2 = pnand %p312_p1, %p309_p0 }
   0x8   :  { %317 = shalt.err (!%p314_p2)
}
   0x9   :  { %s318_s29 = scalar_lea.vmem %s21_s21, 256  ;;  %p323_p4 = scmp.lt.s32.totalorder %s21_s21, %s21_s21 }
   0xa   :  { %p319_p3 = scmp.ne.s32.totalorder %s21_s21, %s318_s29  ;;  %p324_p5 = scmp.lt.s32.totalorder %s318_s29, %s318_s29 }
   0xc   :  { %p325_p6 = por %p324_p5, %p323_p4 }
   0xe   :  { %p326_p7 = pnand %p325_p6, %p319_p3 }
  0x10   :  { %329 = shalt.err (!%p326_p7)
}
  0x11   :  { %s381_s30 = smov 128   ;;  %s382_s7 = smov 8  }
  0x12   :  { %26 = dma.hbm_to_vmem [thread:$0]  %s486_s1, 256, %s21_s21, [#allocation5], %s381_s30, %s381_s30, %s382_s7  }
  0x13   :  { %s383_s10 = smov [#allocation7]   ;;  %s330_s14 = scalar_lea.hbm %s489_s4, 1024 }
  0x14   :  { %s36_s11 = sshll.u32 %s383_s10, 4  ;;  %p331_p8 = scmp.ne.s32.totalorder %s489_s4, %s330_s14  ;;  %s37_s11 = int_to_ptr.vmem [resolvable:$true] %s36_s11 }
  0x15   :  { %p334_p9 = scmp.lt.u32.totalorder %s330_s14, %s489_s4 }
  0x17   :  { %p336_p10 = pnand %p334_p9, %p331_p8 }
  0x19   :  { %339 = shalt.err (!%p336_p10)
}
  0x1a   :  { %s340_s19 = scalar_lea.vmem %s37_s11, 1024  ;;  %p345_p12 = scmp.lt.s32.totalorder %s37_s11, %s37_s11 }
  0x1b   :  { %p341_p11 = scmp.ne.s32.totalorder %s37_s11, %s340_s19  ;;  %p346_p13 = scmp.lt.s32.totalorder %s340_s19, %s340_s19 }
  0x1d   :  { %p347_p0 = por %p346_p13, %p345_p12 }
  0x1f   :  { %p348_p1 = pnand %p347_p0, %p341_p11 }
  0x21   :  { %351 = shalt.err (!%p348_p1)
}
  0x22   :  { %s384_s1 = smov 64   ;;  %s385_s20 = smov 4  }
  0x23   :  { %42 = dma.hbm_to_vmem [thread:$0]  %s489_s4, 1024, %s37_s11, [#allocation8], %s384_s1, %s384_s1, %s385_s20  }
  0x24   :  { %374 = dma.done.wait [#allocation5], 256  }
  0x25   :  { %375 = vsyncadd [#allocation5], 4294967040 }
  0x26   :  { %376 = dma.done.wait [#allocation8], 1024  }
  0x27   :  { %377 = vsyncadd [#allocation8], 4294966272  ;;  %v451_v0 = vld [vmem:[#allocation4] sm:$0xff]  ;;  %v453_v1 = vld [vmem:[#allocation4 + $0x8] sm:$0xff]  ;;  %v386_v11 = vmov 0.0   ;;  %vm387_vm0 = vmmov 0  }
  0x28   :  { %54 = vadd.xlane.f32.xlu0 %v451_v0  ;;  %v292_v10 = vld [vmem:[#allocation7] sm:$0xff]   ;;  %263 = vmatprep.subr.bf16.mxu0 %v386_v11  ;;  %v293_v12 = vld [vmem:[#allocation7 + $0x8] sm:$0xff]   ;;  %v294_v13 = vld [vmem:[#allocation7 + $0x10] sm:$0xff]  }
  0x29   :  { %264 = vmatpush3.bf16.msra.mxu0 %v292_v10  ;;  %v295_v14 = vld [vmem:[#allocation7 + $0x18] sm:$0xff]   ;;  %279 = vmatprep.mubr.msk.bf16.mxu0 %vm387_vm0, %v386_v11  ;;  %v296_v15 = vld [vmem:[#allocation7 + $0x20] sm:$0xff]   ;;  %v297_v16 = vld [vmem:[#allocation7 + $0x28] sm:$0xff]  }
  0x2a   :  { %265 = vmatprep.subr.bf16.mxu0 %v386_v11  ;;  %v298_v17 = vld [vmem:[#allocation7 + $0x30] sm:$0xff]   ;;  %v299_v18 = vld [vmem:[#allocation7 + $0x38] sm:$0xff]  }
  0x2b   :  { %v243_v35 = vld [vmem:[%s487_s2] ss:$0 sm:$0xff]  ;;  %s388_s2 = smov [#allocation9]  }
  0x2c   :  { %56 = vadd.xlane.f32.xlu0 %v453_v1  ;;  %v244_v41 = vld [vmem:[%s488_s3] ss:$0 sm:$0xff]  ;;  %s230_s27 = sshll.u32 %s388_s2, 4  ;;  %s231_s27 = int_to_ptr.vmem [resolvable:$true] %s230_s27 }
  0x2d   :  { %266 = vmatpush3.bf16.msra.mxu0 %v293_v12  ;;  %v245_v46 = vld [vmem:[%s490_s5] ss:$0 sm:$0xff]  ;;  %s352_s3 = scalar_lea.vmem %s231_s27, 256  ;;  %p357_p3 = scmp.lt.s32.totalorder %s231_s27, %s231_s27 }
  0x2e   :  { %267 = vmatprep.subr.bf16.mxu0 %v386_v11  ;;  %p353_p2 = scmp.ne.s32.totalorder %s231_s27, %s352_s3  ;;  %p358_p4 = scmp.lt.s32.totalorder %s352_s3, %s352_s3 }
  0x30   :  { %p359_p5 = por %p358_p4, %p357_p3 }
  0x31   :  { %268 = vmatpush3.bf16.msra.mxu0 %v294_v13 }
  0x32   :  { %269 = vmatprep.subr.bf16.mxu0 %v386_v11  ;;  %p360_p6 = pnand %p359_p5, %p353_p2 }
  0x35   :  { %270 = vmatpush3.bf16.msra.mxu0 %v295_v14 }
  0x36   :  { %271 = vmatprep.subr.bf16.mxu0 %v386_v11 }
  0x39   :  { %272 = vmatpush3.bf16.msra.mxu0 %v296_v15 }
  0x3a   :  { %273 = vmatprep.subr.bf16.mxu0 %v386_v11 }
  0x3d   :  { %274 = vmatpush3.bf16.msra.mxu0 %v297_v16 }
  0x3e   :  { %275 = vmatprep.subr.bf16.mxu0 %v386_v11 }
  0x41   :  { %276 = vmatpush3.bf16.msra.mxu0 %v298_v17 }
  0x42   :  { %277 = vmatprep.subr.bf16.mxu0 %v386_v11 }
  0x45   :  { %278 = vmatpush3.bf16.msra.mxu0 %v299_v18 }
  0xb5   :  { %v55_v2 = vpop.xlane.xlu0 %54 }
  0xb6   :  { %v58_v3 = vmul.f32 0.0078125, %v55_v2 }
  0xb8   :  { %v60_v4 = vsub.f32 %v451_v0, %v58_v3 }
  0xb9   :  { %v57_v5 = vpop.xlane.xlu0 %56 }
  0xba   :  { %v59_v6 = vmul.f32 0.0078125, %v57_v5  ;;  %v62_v7 = vmul.f32 %v60_v4, %v60_v4  ;;  %v95_v37 = vmul.f32 %v243_v35, %v60_v4 }
  0xbc   :  { %v61_v8 = vsub.f32 %v453_v1, %v59_v6  ;;  %64 = vadd.xlane.f32.xlu1 %v62_v7 }
  0xbe   :  { %v63_v9 = vmul.f32 %v61_v8, %v61_v8  ;;  %v96_v38 = vmul.f32 %v243_v35, %v61_v8 }
  0xc0   :  { %66 = vadd.xlane.f32.xlu1 %v63_v9 }
 0x149   :  { %v65_v19 = vpop.xlane.xlu1 %64 }
 0x14a   :  { %v68_v20 = vmul.f32 0.007874016, %v65_v19 }
 0x14c   :  { %300 = vrsqrt.f32 %v68_v20  ;;  %vm72_vm1 = vcmp.eq.f32.partialorder %v68_v20, inf  ;;  %v75_v25 = vand.u32 2147483648, %v68_v20  ;;  %vm74_vm2 = vcmp.eq.f32.partialorder %v68_v20, 0.0 }
 0x14d   :  { %v67_v21 = vpop.xlane.xlu1 %66 }
 0x14e   :  { %v69_v22 = vmul.f32 0.007874016, %v67_v21 }
 0x150   :  { %302 = vrsqrt.f32 %v69_v22  ;;  %vm79_vm3 = vcmp.eq.f32.partialorder %v69_v22, inf  ;;  %v82_v31 = vand.u32 2147483648, %v69_v22  ;;  %vm81_vm4 = vcmp.eq.f32.partialorder %v69_v22, 0.0 }
 0x156   :  { %v301_v23 = vpop.eup %300 }
 0x157   :  { %v71_v24 = vmul.f32 %v301_v23, %v68_v20 }
 0x159   :  { %v73_v26 = vsel %vm72_vm1, %v68_v20, %v71_v24 }
 0x15a   :  { %v303_v27 = vpop.eup %302  ;;  %v76_v28 = vsel %vm74_vm2, %v75_v25, %v73_v26 }
 0x15b   :  { %v78_v29 = vmul.f32 %v303_v27, %v69_v22  ;;  %v84_v30 = vadd.f32 1e-05, %v76_v28 }
 0x15d   :  { %v80_v32 = vsel %vm79_vm3, %v69_v22, %v78_v29  ;;  %304 = vrcp.f32 %v84_v30 }
 0x15e   :  { %v83_v33 = vsel %vm81_vm4, %v82_v31, %v80_v32 }
 0x15f   :  { %v85_v34 = vadd.f32 1e-05, %v83_v33 }
 0x161   :  { %306 = vrcp.f32 %v85_v34 }
 0x167   :  { %v305_v36 = vpop.eup %304 }
 0x168   :  { %v97_v39 = vmul.f32 %v305_v36, %v95_v37 }
 0x16a   :  { %v106_v43 = vadd.f32 %v244_v41, %v97_v39 }
 0x16b   :  { %v307_v40 = vpop.eup %306 }
 0x16c   :  { %v98_v42 = vmul.f32 %v307_v40, %v96_v38 }
 0x16e   :  { %v107_v44 = vadd.f32 %v244_v41, %v98_v42 }
 0x170   :  { %v108_v45 = vpack.c.bf16 %v107_v44, %v106_v43 }
 0x172   :  { %280 = vmatmul.mubr.bf16.vlgmr.msra.gmra.mrb[0].mxu0 %v108_v45 }
 0x245   :  { %v214_v47 = vpop.f32.mrb[0].mxu0 }
 0x246   :  { %v215_v48 = vadd.f32 %v245_v46, %v214_v47  ;;  %v281_v49 = vpop.f32.mrb[1].mxu0 }
 0x247   :  { %v217_v50 = vpop.f32.mrb[2].mxu0 }
 0x248   :  { %v221_v51 = vadd.f32 %v215_v48, %v451_v0  ;;  %v218_v52 = vadd.f32 %v245_v46, %v217_v50  ;;  %v282_v53 = vpop.f32.mrb[3].mxu0 }
 0x24a   :  { %223 = vst [vmem:[#allocation9] sm:$0xff] %v221_v51  ;;  %v222_v54 = vadd.f32 %v218_v52, %v453_v1 }
 0x24c   :  { %224 = vst [vmem:[#allocation9 + $0x8] sm:$0xff] %v222_v54 }
 0x24d   :  { %363 = shalt.err (!%p360_p6)
}
 0x24e   :  { %s364_s29 = scalar_lea.hbm %s491_s6, 256 }
 0x24f   :  { %p365_p7 = scmp.ne.s32.totalorder %s491_s6, %s364_s29  ;;  %p368_p8 = scmp.lt.u32.totalorder %s364_s29, %s491_s6 }
 0x251   :  { %p370_p9 = pnand %p368_p8, %p365_p7 }
 0x253   :  { %373 = shalt.err (!%p370_p9)
}
 0x254   :  { %236 = dma.vmem_to_hbm [thread:$0]  %s231_s27, 256, %s491_s6, [#allocation6], %s381_s30, %s381_s30, %s382_s7  }
 0x255   :  { %378 = dma.done.wait [#allocation6], 256  }
 0x256   :  { %379 = vsyncadd [#allocation6], 4294967040 }
 0x257   :  { %240 = vsyncpa [#allocation5], 1 }
 0x258   :  { %241 = vsyncpa [#allocation8], 1 }
 0x259   :  { %242 = vsyncpa [#allocation6], 1 }

</bundles_post_ra>
